<compile_context>
chip_gen: v6e
topology: v6e:2x2x1
jax: 0.10.0
libtpu: 0.0.40
codegen_flags: <defaults>
</compile_context>

<pallas_src>
import functools

import jax
import jax.numpy as jnp
from jax import lax
from jax.experimental import pallas as pl
from jax.experimental.pallas import tpu as pltpu


def _round_up(x: int, m: int) -> int:
    return ((x + m - 1) // m) * m


def _postpred_kernel(x_ref, o_ref, *, num_classes: int):
    # x_ref: (5 + num_classes, TR, 128)  -- full vreg-dense channel planes
    # o_ref: (6, TR, 128) float32        -- (x1, y1, x2, y2, conf, class) planes
    f32 = jnp.float32

    cx = x_ref[0].astype(f32)
    cy = x_ref[1].astype(f32)
    w = x_ref[2].astype(f32)
    h = x_ref[3].astype(f32)
    obj = x_ref[4].astype(f32)

    # Box decode: direct full-plane stores (lane- and sublane-dense).
    o_ref[0] = cx - w * 0.5
    o_ref[1] = cy - h * 0.5
    o_ref[2] = cx + w * 0.5
    o_ref[3] = cy + h * 0.5

    # Running max / first-match argmax over class planes (VPU select chain).
    best = x_ref[5].astype(f32)
    best_idx = jnp.zeros_like(best)

    if num_classes < 128:
        # Fully unrolled: small C keeps code size / live ranges modest.
        for c in range(1, num_classes):
            sc = x_ref[5 + c].astype(f32)
            pick = sc > best  # strict '>' keeps the first max -> argmax semantics
            best = jnp.where(pick, sc, best)
            best_idx = jnp.where(pick, jnp.float32(c), best_idx)
    else:
        # Large C: bounded-live-range loop with dynamic plane index.
        def body(c, carry):
            b, bi = carry
            sc = x_ref[5 + c].astype(f32)
            pick = sc > b
            b = jnp.where(pick, sc, b)
            bi = jnp.where(pick, c.astype(f32), bi)
            return b, bi

        best, best_idx = lax.fori_loop(1, num_classes, body, (best, best_idx),
                                       unroll=8)

    o_ref[4] = obj * best
    o_ref[5] = best_idx


def detection_post_prediction(x_cn: jax.Array, *, max_rows_per_tile: int = 64
                              ) -> jax.Array:
    """Decode raw detection-head output.

    x_cn: (B, 5 + num_classes, N) float32/bfloat16, channels-first
          (cx, cy, w, h, obj, class_scores...).
    Returns (B, 6, N) float32 with rows (x1, y1, x2, y2, confidence, class).
    Callers needing per-image (n, 6) views should index columns of this array.
    """
    B, C5, N = x_cn.shape
    num_classes = C5 - 5
    assert num_classes >= 1

    # Map N onto (rows, 128 lanes). Rows per tile must be a multiple of 8
    # (16 for bf16 so packed loads stay unmasked).
    row_mult = 16 if x_cn.dtype == jnp.bfloat16 else 8
    n_rows = pl.cdiv(N, 128)

    tr = max_rows_per_tile
    if B == 1:
        # Guarantee >=2 grid steps so both v7x TensorCores are used.
        tr = min(tr, _round_up(pl.cdiv(n_rows, 2), row_mult))
    tr = min(tr, _round_up(n_rows, row_mult))
    tr = max(_round_up(tr, row_mult), row_mult)

    n_rows_pad = _round_up(n_rows, tr)
    n_pad = n_rows_pad * 128
    if n_pad != N:
        x_cn = jnp.pad(x_cn, ((0, 0), (0, 0), (0, n_pad - N)))
    x4 = x_cn.reshape(B, C5, n_rows_pad, 128)

    grid = (B, n_rows_pad // tr)
    in_itemsize = jnp.dtype(x_cn.dtype).itemsize
    cost = pl.CostEstimate(
        flops=B * n_pad * (3 * num_classes + 10),
        transcendentals=0,
        bytes_accessed=B * n_pad * (C5 * in_itemsize + 6 * 4),
    )

    out4 = pl.pallas_call(
        functools.partial(_postpred_kernel, num_classes=num_classes),
        out_shape=jax.ShapeDtypeStruct((B, 6, n_rows_pad, 128), jnp.float32),
        grid_spec=pl.GridSpec(
            grid=grid,
            in_specs=[pl.BlockSpec((None, C5, tr, 128),
                                   lambda b, j: (b, 0, j, 0))],
            out_specs=pl.BlockSpec((None, 6, tr, 128),
                                   lambda b, j: (b, 0, j, 0)),
        ),
        compiler_params=pltpu.CompilerParams(
            dimension_semantics=("parallel", "parallel"),
        ),
        cost_estimate=cost,
    )(x4)

    # Drop lane padding (padded tail would otherwise look like class=0/conf=0
    # fake detections); stay channels-first to avoid a transpose.
    return out4.reshape(B, 6, n_pad)[:, :, :N]


def _reference_cn(x_cn):
    x = x_cn.astype(jnp.float32)
    cx, cy, w, h, obj = (x[:, i] for i in range(5))
    cls_scores = x[:, 5:]                      # (B, C, N)
    best = cls_scores.max(axis=1)
    cls_idx = cls_scores.argmax(axis=1).astype(jnp.float32)
    conf = obj * best
    return jnp.stack([cx - w * 0.5, cy - h * 0.5,
                      cx + w * 0.5, cy + h * 0.5, conf, cls_idx], axis=1)


if __name__ == "__main__":
    key = jax.random.PRNGKey(0)

    # float32 path: N not a multiple of 128*tile -> exercises padding.
    B, N, num_classes = 2, 384, 16
    k1, k2 = jax.random.split(key)
    x = jax.random.uniform(k1, (B, 5 + num_classes, N), dtype=jnp.float32)
    dets = jax.block_until_ready(detection_post_prediction(x))
    ref = _reference_cn(x)
    assert dets.shape == (B, 6, N)
    assert jnp.allclose(dets, ref, atol=1e-5, rtol=1e-5)

    # bfloat16 path (halves HBM read traffic); compare against the reference
    # computed on the same bf16-rounded values.
    x_bf16 = x.astype(jnp.bfloat16)
    dets_bf = jax.block_until_ready(detection_post_prediction(x_bf16))
    ref_bf = _reference_cn(x_bf16)
    assert jnp.allclose(dets_bf, ref_bf, atol=1e-5, rtol=1e-5)

    # Large-num_classes path (fori_loop branch) + B==1 two-tile split.
    B2, N2, num_classes2 = 1, 256, 150
    x_big = jax.random.uniform(k2, (B2, 5 + num_classes2, N2),
                               dtype=jnp.float32)
    dets_big = jax.block_until_ready(detection_post_prediction(x_big))
    ref_big = _reference_cn(x_big)
    assert dets_big.shape == (B2, 6, N2)
    assert jnp.allclose(dets_big, ref_big, atol=1e-5, rtol=1e-5)

    print("KERNEL_OK")
</pallas_src>

<mosaic_0001>
module attributes {stable_mosaic.version = 11 : i64} {
  func.func @_postpred_kernel(%arg0: i32, %arg1: i32, %arg2: memref<1x21x8x128xf32, #tpu.memory_space<vmem>>, %arg3: memref<1x6x8x128xf32, #tpu.memory_space<vmem>>) attributes {dimension_semantics = [#tpu.dimension_semantics<parallel>, #tpu.dimension_semantics<parallel>], iteration_bounds = array<i64: 2, 1>, scalar_prefetch = 0 : i64, scratch_operands = 0 : i64, tpu.core_type = #tpu.core_type<tc>, window_params = [{transform_indices = @transform_0, window_bounds = array<i64: 1, 21, 8, 128>}, {transform_indices = @transform_1, window_bounds = array<i64: 1, 6, 8, 128>}]} {
    %c0 = arith.constant 0 : index
    %c0_0 = arith.constant 0 : index
    %c0_1 = arith.constant 0 : index
    %c0_2 = arith.constant 0 : index
    %0 = vector.load %arg2[%c0, %c0_0, %c0_1, %c0_2] : memref<1x21x8x128xf32, #tpu.memory_space<vmem>>, vector<1x1x8x128xf32>
    %1 = vector.shape_cast %0 : vector<1x1x8x128xf32> to vector<8x128xf32>
    %c0_3 = arith.constant 0 : index
    %c1 = arith.constant 1 : index
    %c0_4 = arith.constant 0 : index
    %c0_5 = arith.constant 0 : index
    %2 = vector.load %arg2[%c0_3, %c1, %c0_4, %c0_5] : memref<1x21x8x128xf32, #tpu.memory_space<vmem>>, vector<1x1x8x128xf32>
    %3 = vector.shape_cast %2 : vector<1x1x8x128xf32> to vector<8x128xf32>
    %c0_6 = arith.constant 0 : index
    %c2 = arith.constant 2 : index
    %c0_7 = arith.constant 0 : index
    %c0_8 = arith.constant 0 : index
    %4 = vector.load %arg2[%c0_6, %c2, %c0_7, %c0_8] : memref<1x21x8x128xf32, #tpu.memory_space<vmem>>, vector<1x1x8x128xf32>
    %5 = vector.shape_cast %4 : vector<1x1x8x128xf32> to vector<8x128xf32>
    %c0_9 = arith.constant 0 : index
    %c3 = arith.constant 3 : index
    %c0_10 = arith.constant 0 : index
    %c0_11 = arith.constant 0 : index
    %6 = vector.load %arg2[%c0_9, %c3, %c0_10, %c0_11] : memref<1x21x8x128xf32, #tpu.memory_space<vmem>>, vector<1x1x8x128xf32>
    %7 = vector.shape_cast %6 : vector<1x1x8x128xf32> to vector<8x128xf32>
    %c0_12 = arith.constant 0 : index
    %c4 = arith.constant 4 : index
    %c0_13 = arith.constant 0 : index
    %c0_14 = arith.constant 0 : index
    %8 = vector.load %arg2[%c0_12, %c4, %c0_13, %c0_14] : memref<1x21x8x128xf32, #tpu.memory_space<vmem>>, vector<1x1x8x128xf32>
    %9 = vector.shape_cast %8 : vector<1x1x8x128xf32> to vector<8x128xf32>
    %cst = arith.constant 5.000000e-01 : f32
    %10 = vector.broadcast %cst : f32 to vector<8x128xf32>
    %11 = arith.mulf %5, %10 : vector<8x128xf32>
    %12 = arith.subf %1, %11 : vector<8x128xf32>
    %c0_15 = arith.constant 0 : index
    %c0_16 = arith.constant 0 : index
    %c0_17 = arith.constant 0 : index
    %c0_18 = arith.constant 0 : index
    %13 = vector.load %arg3[%c0_15, %c0_16, %c0_17, %c0_18] : memref<1x6x8x128xf32, #tpu.memory_space<vmem>>, vector<1x1x8x128xf32>
    %14 = vector.shape_cast %13 : vector<1x1x8x128xf32> to vector<8x128xf32>
    %15 = vector.shape_cast %12 : vector<8x128xf32> to vector<1x1x8x128xf32>
    tpu.vector_store %arg3[%c0_15, %c0_16, %c0_17, %c0_18], %15 {strides = array<i32>} : memref<1x6x8x128xf32, #tpu.memory_space<vmem>>, vector<1x1x8x128xf32>,
    %cst_19 = arith.constant 5.000000e-01 : f32
    %16 = vector.broadcast %cst_19 : f32 to vector<8x128xf32>
    %17 = arith.mulf %7, %16 : vector<8x128xf32>
    %18 = arith.subf %3, %17 : vector<8x128xf32>
    %c0_20 = arith.constant 0 : index
    %c1_21 = arith.constant 1 : index
    %c0_22 = arith.constant 0 : index
    %c0_23 = arith.constant 0 : index
    %19 = vector.load %arg3[%c0_20, %c1_21, %c0_22, %c0_23] : memref<1x6x8x128xf32, #tpu.memory_space<vmem>>, vector<1x1x8x128xf32>
    %20 = vector.shape_cast %19 : vector<1x1x8x128xf32> to vector<8x128xf32>
    %21 = vector.shape_cast %18 : vector<8x128xf32> to vector<1x1x8x128xf32>
    tpu.vector_store %arg3[%c0_20, %c1_21, %c0_22, %c0_23], %21 {strides = array<i32>} : memref<1x6x8x128xf32, #tpu.memory_space<vmem>>, vector<1x1x8x128xf32>,
    %cst_24 = arith.constant 5.000000e-01 : f32
    %22 = vector.broadcast %cst_24 : f32 to vector<8x128xf32>
    %23 = arith.mulf %5, %22 : vector<8x128xf32>
    %24 = arith.addf %1, %23 : vector<8x128xf32>
    %c0_25 = arith.constant 0 : index
    %c2_26 = arith.constant 2 : index
    %c0_27 = arith.constant 0 : index
    %c0_28 = arith.constant 0 : index
    %25 = vector.load %arg3[%c0_25, %c2_26, %c0_27, %c0_28] : memref<1x6x8x128xf32, #tpu.memory_space<vmem>>, vector<1x1x8x128xf32>
    %26 = vector.shape_cast %25 : vector<1x1x8x128xf32> to vector<8x128xf32>
    %27 = vector.shape_cast %24 : vector<8x128xf32> to vector<1x1x8x128xf32>
    tpu.vector_store %arg3[%c0_25, %c2_26, %c0_27, %c0_28], %27 {strides = array<i32>} : memref<1x6x8x128xf32, #tpu.memory_space<vmem>>, vector<1x1x8x128xf32>,
    %cst_29 = arith.constant 5.000000e-01 : f32
    %28 = vector.broadcast %cst_29 : f32 to vector<8x128xf32>
    %29 = arith.mulf %7, %28 : vector<8x128xf32>
    %30 = arith.addf %3, %29 : vector<8x128xf32>
    %c0_30 = arith.constant 0 : index
    %c3_31 = arith.constant 3 : index
    %c0_32 = arith.constant 0 : index
    %c0_33 = arith.constant 0 : index
    %31 = vector.load %arg3[%c0_30, %c3_31, %c0_32, %c0_33] : memref<1x6x8x128xf32, #tpu.memory_space<vmem>>, vector<1x1x8x128xf32>
    %32 = vector.shape_cast %31 : vector<1x1x8x128xf32> to vector<8x128xf32>
    %33 = vector.shape_cast %30 : vector<8x128xf32> to vector<1x1x8x128xf32>
    tpu.vector_store %arg3[%c0_30, %c3_31, %c0_32, %c0_33], %33 {strides = array<i32>} : memref<1x6x8x128xf32, #tpu.memory_space<vmem>>, vector<1x1x8x128xf32>,
    %c0_34 = arith.constant 0 : index
    %c5 = arith.constant 5 : index
    %c0_35 = arith.constant 0 : index
    %c0_36 = arith.constant 0 : index
    %34 = vector.load %arg2[%c0_34, %c5, %c0_35, %c0_36] : memref<1x21x8x128xf32, #tpu.memory_space<vmem>>, vector<1x1x8x128xf32>
    %35 = vector.shape_cast %34 : vector<1x1x8x128xf32> to vector<8x128xf32>
    %cst_37 = arith.constant 0.000000e+00 : f32
    %36 = vector.broadcast %cst_37 : f32 to vector<8x128xf32>
    %c0_38 = arith.constant 0 : index
    %c6 = arith.constant 6 : index
    %c0_39 = arith.constant 0 : index
    %c0_40 = arith.constant 0 : index
    %37 = vector.load %arg2[%c0_38, %c6, %c0_39, %c0_40] : memref<1x21x8x128xf32, #tpu.memory_space<vmem>>, vector<1x1x8x128xf32>
    %38 = vector.shape_cast %37 : vector<1x1x8x128xf32> to vector<8x128xf32>
    %39 = arith.cmpf ogt, %38, %35 : vector<8x128xf32>
    %40 = arith.select %39, %38, %35 : vector<8x128xi1>, vector<8x128xf32>
    %cst_41 = arith.constant 1.000000e+00 : f32
    %41 = vector.broadcast %cst_41 : f32 to vector<8x128xf32>
    %42 = arith.select %39, %41, %36 : vector<8x128xi1>, vector<8x128xf32>
    %c0_42 = arith.constant 0 : index
    %c7 = arith.constant 7 : index
    %c0_43 = arith.constant 0 : index
    %c0_44 = arith.constant 0 : index
    %43 = vector.load %arg2[%c0_42, %c7, %c0_43, %c0_44] : memref<1x21x8x128xf32, #tpu.memory_space<vmem>>, vector<1x1x8x128xf32>
    %44 = vector.shape_cast %43 : vector<1x1x8x128xf32> to vector<8x128xf32>
    %45 = arith.cmpf ogt, %44, %40 : vector<8x128xf32>
    %46 = arith.select %45, %44, %40 : vector<8x128xi1>, vector<8x128xf32>
    %cst_45 = arith.constant 2.000000e+00 : f32
    %47 = vector.broadcast %cst_45 : f32 to vector<8x128xf32>
    %48 = arith.select %45, %47, %42 : vector<8x128xi1>, vector<8x128xf32>
    %c0_46 = arith.constant 0 : index
    %c8 = arith.constant 8 : index
    %c0_47 = arith.constant 0 : index
    %c0_48 = arith.constant 0 : index
    %49 = vector.load %arg2[%c0_46, %c8, %c0_47, %c0_48] : memref<1x21x8x128xf32, #tpu.memory_space<vmem>>, vector<1x1x8x128xf32>
    %50 = vector.shape_cast %49 : vector<1x1x8x128xf32> to vector<8x128xf32>
    %51 = arith.cmpf ogt, %50, %46 : vector<8x128xf32>
    %52 = arith.select %51, %50, %46 : vector<8x128xi1>, vector<8x128xf32>
    %cst_49 = arith.constant 3.000000e+00 : f32
    %53 = vector.broadcast %cst_49 : f32 to vector<8x128xf32>
    %54 = arith.select %51, %53, %48 : vector<8x128xi1>, vector<8x128xf32>
    %c0_50 = arith.constant 0 : index
    %c9 = arith.constant 9 : index
    %c0_51 = arith.constant 0 : index
    %c0_52 = arith.constant 0 : index
    %55 = vector.load %arg2[%c0_50, %c9, %c0_51, %c0_52] : memref<1x21x8x128xf32, #tpu.memory_space<vmem>>, vector<1x1x8x128xf32>
    %56 = vector.shape_cast %55 : vector<1x1x8x128xf32> to vector<8x128xf32>
    %57 = arith.cmpf ogt, %56, %52 : vector<8x128xf32>
    %58 = arith.select %57, %56, %52 : vector<8x128xi1>, vector<8x128xf32>
    %cst_53 = arith.constant 4.000000e+00 : f32
    %59 = vector.broadcast %cst_53 : f32 to vector<8x128xf32>
    %60 = arith.select %57, %59, %54 : vector<8x128xi1>, vector<8x128xf32>
    %c0_54 = arith.constant 0 : index
    %c10 = arith.constant 10 : index
    %c0_55 = arith.constant 0 : index
    %c0_56 = arith.constant 0 : index
    %61 = vector.load %arg2[%c0_54, %c10, %c0_55, %c0_56] : memref<1x21x8x128xf32, #tpu.memory_space<vmem>>, vector<1x1x8x128xf32>
    %62 = vector.shape_cast %61 : vector<1x1x8x128xf32> to vector<8x128xf32>
    %63 = arith.cmpf ogt, %62, %58 : vector<8x128xf32>
    %64 = arith.select %63, %62, %58 : vector<8x128xi1>, vector<8x128xf32>
    %cst_57 = arith.constant 5.000000e+00 : f32
    %65 = vector.broadcast %cst_57 : f32 to vector<8x128xf32>
    %66 = arith.select %63, %65, %60 : vector<8x128xi1>, vector<8x128xf32>
    %c0_58 = arith.constant 0 : index
    %c11 = arith.constant 11 : index
    %c0_59 = arith.constant 0 : index
    %c0_60 = arith.constant 0 : index
    %67 = vector.load %arg2[%c0_58, %c11, %c0_59, %c0_60] : memref<1x21x8x128xf32, #tpu.memory_space<vmem>>, vector<1x1x8x128xf32>
    %68 = vector.shape_cast %67 : vector<1x1x8x128xf32> to vector<8x128xf32>
    %69 = arith.cmpf ogt, %68, %64 : vector<8x128xf32>
    %70 = arith.select %69, %68, %64 : vector<8x128xi1>, vector<8x128xf32>
    %cst_61 = arith.constant 6.000000e+00 : f32
    %71 = vector.broadcast %cst_61 : f32 to vector<8x128xf32>
    %72 = arith.select %69, %71, %66 : vector<8x128xi1>, vector<8x128xf32>
    %c0_62 = arith.constant 0 : index
    %c12 = arith.constant 12 : index
    %c0_63 = arith.constant 0 : index
    %c0_64 = arith.constant 0 : index
    %73 = vector.load %arg2[%c0_62, %c12, %c0_63, %c0_64] : memref<1x21x8x128xf32, #tpu.memory_space<vmem>>, vector<1x1x8x128xf32>
    %74 = vector.shape_cast %73 : vector<1x1x8x128xf32> to vector<8x128xf32>
    %75 = arith.cmpf ogt, %74, %70 : vector<8x128xf32>
    %76 = arith.select %75, %74, %70 : vector<8x128xi1>, vector<8x128xf32>
    %cst_65 = arith.constant 7.000000e+00 : f32
    %77 = vector.broadcast %cst_65 : f32 to vector<8x128xf32>
    %78 = arith.select %75, %77, %72 : vector<8x128xi1>, vector<8x128xf32>
    %c0_66 = arith.constant 0 : index
    %c13 = arith.constant 13 : index
    %c0_67 = arith.constant 0 : index
    %c0_68 = arith.constant 0 : index
    %79 = vector.load %arg2[%c0_66, %c13, %c0_67, %c0_68] : memref<1x21x8x128xf32, #tpu.memory_space<vmem>>, vector<1x1x8x128xf32>
    %80 = vector.shape_cast %79 : vector<1x1x8x128xf32> to vector<8x128xf32>
    %81 = arith.cmpf ogt, %80, %76 : vector<8x128xf32>
    %82 = arith.select %81, %80, %76 : vector<8x128xi1>, vector<8x128xf32>
    %cst_69 = arith.constant 8.000000e+00 : f32
    %83 = vector.broadcast %cst_69 : f32 to vector<8x128xf32>
    %84 = arith.select %81, %83, %78 : vector<8x128xi1>, vector<8x128xf32>
    %c0_70 = arith.constant 0 : index
    %c14 = arith.constant 14 : index
    %c0_71 = arith.constant 0 : index
    %c0_72 = arith.constant 0 : index
    %85 = vector.load %arg2[%c0_70, %c14, %c0_71, %c0_72] : memref<1x21x8x128xf32, #tpu.memory_space<vmem>>, vector<1x1x8x128xf32>
    %86 = vector.shape_cast %85 : vector<1x1x8x128xf32> to vector<8x128xf32>
    %87 = arith.cmpf ogt, %86, %82 : vector<8x128xf32>
    %88 = arith.select %87, %86, %82 : vector<8x128xi1>, vector<8x128xf32>
    %cst_73 = arith.constant 9.000000e+00 : f32
    %89 = vector.broadcast %cst_73 : f32 to vector<8x128xf32>
    %90 = arith.select %87, %89, %84 : vector<8x128xi1>, vector<8x128xf32>
    %c0_74 = arith.constant 0 : index
    %c15 = arith.constant 15 : index
    %c0_75 = arith.constant 0 : index
    %c0_76 = arith.constant 0 : index
    %91 = vector.load %arg2[%c0_74, %c15, %c0_75, %c0_76] : memref<1x21x8x128xf32, #tpu.memory_space<vmem>>, vector<1x1x8x128xf32>
    %92 = vector.shape_cast %91 : vector<1x1x8x128xf32> to vector<8x128xf32>
    %93 = arith.cmpf ogt, %92, %88 : vector<8x128xf32>
    %94 = arith.select %93, %92, %88 : vector<8x128xi1>, vector<8x128xf32>
    %cst_77 = arith.constant 1.000000e+01 : f32
    %95 = vector.broadcast %cst_77 : f32 to vector<8x128xf32>
    %96 = arith.select %93, %95, %90 : vector<8x128xi1>, vector<8x128xf32>
    %c0_78 = arith.constant 0 : index
    %c16 = arith.constant 16 : index
    %c0_79 = arith.constant 0 : index
    %c0_80 = arith.constant 0 : index
    %97 = vector.load %arg2[%c0_78, %c16, %c0_79, %c0_80] : memref<1x21x8x128xf32, #tpu.memory_space<vmem>>, vector<1x1x8x128xf32>
    %98 = vector.shape_cast %97 : vector<1x1x8x128xf32> to vector<8x128xf32>
    %99 = arith.cmpf ogt, %98, %94 : vector<8x128xf32>
    %100 = arith.select %99, %98, %94 : vector<8x128xi1>, vector<8x128xf32>
    %cst_81 = arith.constant 1.100000e+01 : f32
    %101 = vector.broadcast %cst_81 : f32 to vector<8x128xf32>
    %102 = arith.select %99, %101, %96 : vector<8x128xi1>, vector<8x128xf32>
    %c0_82 = arith.constant 0 : index
    %c17 = arith.constant 17 : index
    %c0_83 = arith.constant 0 : index
    %c0_84 = arith.constant 0 : index
    %103 = vector.load %arg2[%c0_82, %c17, %c0_83, %c0_84] : memref<1x21x8x128xf32, #tpu.memory_space<vmem>>, vector<1x1x8x128xf32>
    %104 = vector.shape_cast %103 : vector<1x1x8x128xf32> to vector<8x128xf32>
    %105 = arith.cmpf ogt, %104, %100 : vector<8x128xf32>
    %106 = arith.select %105, %104, %100 : vector<8x128xi1>, vector<8x128xf32>
    %cst_85 = arith.constant 1.200000e+01 : f32
    %107 = vector.broadcast %cst_85 : f32 to vector<8x128xf32>
    %108 = arith.select %105, %107, %102 : vector<8x128xi1>, vector<8x128xf32>
    %c0_86 = arith.constant 0 : index
    %c18 = arith.constant 18 : index
    %c0_87 = arith.constant 0 : index
    %c0_88 = arith.constant 0 : index
    %109 = vector.load %arg2[%c0_86, %c18, %c0_87, %c0_88] : memref<1x21x8x128xf32, #tpu.memory_space<vmem>>, vector<1x1x8x128xf32>
    %110 = vector.shape_cast %109 : vector<1x1x8x128xf32> to vector<8x128xf32>
    %111 = arith.cmpf ogt, %110, %106 : vector<8x128xf32>
    %112 = arith.select %111, %110, %106 : vector<8x128xi1>, vector<8x128xf32>
    %cst_89 = arith.constant 1.300000e+01 : f32
    %113 = vector.broadcast %cst_89 : f32 to vector<8x128xf32>
    %114 = arith.select %111, %113, %108 : vector<8x128xi1>, vector<8x128xf32>
    %c0_90 = arith.constant 0 : index
    %c19 = arith.constant 19 : index
    %c0_91 = arith.constant 0 : index
    %c0_92 = arith.constant 0 : index
    %115 = vector.load %arg2[%c0_90, %c19, %c0_91, %c0_92] : memref<1x21x8x128xf32, #tpu.memory_space<vmem>>, vector<1x1x8x128xf32>
    %116 = vector.shape_cast %115 : vector<1x1x8x128xf32> to vector<8x128xf32>
    %117 = arith.cmpf ogt, %116, %112 : vector<8x128xf32>
    %118 = arith.select %117, %116, %112 : vector<8x128xi1>, vector<8x128xf32>
    %cst_93 = arith.constant 1.400000e+01 : f32
    %119 = vector.broadcast %cst_93 : f32 to vector<8x128xf32>
    %120 = arith.select %117, %119, %114 : vector<8x128xi1>, vector<8x128xf32>
    %c0_94 = arith.constant 0 : index
    %c20 = arith.constant 20 : index
    %c0_95 = arith.constant 0 : index
    %c0_96 = arith.constant 0 : index
    %121 = vector.load %arg2[%c0_94, %c20, %c0_95, %c0_96] : memref<1x21x8x128xf32, #tpu.memory_space<vmem>>, vector<1x1x8x128xf32>
    %122 = vector.shape_cast %121 : vector<1x1x8x128xf32> to vector<8x128xf32>
    %123 = arith.cmpf ogt, %122, %118 : vector<8x128xf32>
    %124 = arith.select %123, %122, %118 : vector<8x128xi1>, vector<8x128xf32>
    %cst_97 = arith.constant 1.500000e+01 : f32
    %125 = vector.broadcast %cst_97 : f32 to vector<8x128xf32>
    %126 = arith.select %123, %125, %120 : vector<8x128xi1>, vector<8x128xf32>
    %127 = arith.mulf %9, %124 : vector<8x128xf32>
    %c0_98 = arith.constant 0 : index
    %c4_99 = arith.constant 4 : index
    %c0_100 = arith.constant 0 : index
    %c0_101 = arith.constant 0 : index
    %128 = vector.load %arg3[%c0_98, %c4_99, %c0_100, %c0_101] : memref<1x6x8x128xf32, #tpu.memory_space<vmem>>, vector<1x1x8x128xf32>
    %129 = vector.shape_cast %128 : vector<1x1x8x128xf32> to vector<8x128xf32>
    %130 = vector.shape_cast %127 : vector<8x128xf32> to vector<1x1x8x128xf32>
    tpu.vector_store %arg3[%c0_98, %c4_99, %c0_100, %c0_101], %130 {strides = array<i32>} : memref<1x6x8x128xf32, #tpu.memory_space<vmem>>, vector<1x1x8x128xf32>,
    %c0_102 = arith.constant 0 : index
    %c5_103 = arith.constant 5 : index
    %c0_104 = arith.constant 0 : index
    %c0_105 = arith.constant 0 : index
    %131 = vector.load %arg3[%c0_102, %c5_103, %c0_104, %c0_105] : memref<1x6x8x128xf32, #tpu.memory_space<vmem>>, vector<1x1x8x128xf32>
    %132 = vector.shape_cast %131 : vector<1x1x8x128xf32> to vector<8x128xf32>
    %133 = vector.shape_cast %126 : vector<8x128xf32> to vector<1x1x8x128xf32>
    tpu.vector_store %arg3[%c0_102, %c5_103, %c0_104, %c0_105], %133 {strides = array<i32>} : memref<1x6x8x128xf32, #tpu.memory_space<vmem>>, vector<1x1x8x128xf32>,
    return
  }
  func.func @transform_0(%arg0: i32, %arg1: i32) -> (i32, i32, i32, i32) {
    %c0_i32 = arith.constant 0 : i32
    %c0_i32_0 = arith.constant 0 : i32
    %c0_i32_1 = arith.constant 0 : i32
    return %arg0, %c0_i32, %arg1, %c0_i32_0 : i32, i32, i32, i32
  }
  func.func @transform_1(%arg0: i32, %arg1: i32) -> (i32, i32, i32, i32) {
    %c0_i32 = arith.constant 0 : i32
    %c0_i32_0 = arith.constant 0 : i32
    %c0_i32_1 = arith.constant 0 : i32
    return %arg0, %c0_i32, %arg1, %c0_i32_0 : i32, i32, i32, i32
  }
}

</mosaic_0001>

<bundles_post_ra>
// kernel: tpu_custom_call.1
= control target key start
LH: loop header
LB: loop body
LE: loop exit
PB: predicated region body
PF: predicated region fallthrough
CT: control target
= control target key end

     0   :  { %6 = vsyncpa [#allocation3], 0  ;;  %s768_s0 = inlined_call_operand.hbm [shape: f32[2,21,8,128], index: 0, kind: input, shape index: {}]   ;;  %s769_s1 = inlined_call_operand.hbm [shape: f32[2,6,8,128], index: 1, kind: output, shape index: {}]  }
   0x1   :  { %8 = vsyncpa [#allocation3 + $0x1], 0 }
   0x2   :  { %9 = vsyncpa [#allocation4], 0 }
   0x3   :  { %11 = vsyncpa [#allocation4 + $0x1], 0  ;;  %s589_s6 = smov 0   ;;  %s591_s7 = smov 0  }
   0x4   :  { %s593_s8 = smov 0   ;;  %s595_s9 = smov 0  }
   0x5   :  { %s597_s10 = smov 0   ;;  %s599_s11 = smov 0  }
   0x6 LB: > { %s356_s12 = sadd.s32 4294967295, %s570_s11   ;;  %s357_s13 = sadd.s32 4294967294, %s570_s11   ;;  %s570_s11 = sphi %s599_s11, %s17_s11   ;;  %s566_s10 = sphi %s597_s10, %s780_s10   ;;  %s562_s9 = sphi %s595_s9, %s779_s9   ;;  %s558_s8 = sphi %s593_s8, %s778_s8   ;;  %s554_s7 = sphi %s591_s7, %s777_s7   ;;  %s550_s6 = sphi %s589_s6, %s776_s6  }
   0x7   : > { %s29_s14 = sadd.s32 1, %s566_s10  ;;  %s38_s15 = sadd.s32 1, %s558_s8 }
   0x8   : > { %p31_p0 = scmp.ge.s32.totalorder %s29_s14, 2  ;;  %p45_p1 = scmp.ne.s32.totalorder %s558_s8, %s554_s7 }
   0x9   : > { %p46_p2 = scmp.eq.s32.totalorder %s570_s11, 0  ;;  %p51_p3 = scmp.ne.s32.totalorder %s554_s7, %s550_s6 }
   0xa   : > { %s782_s14 = smov (%p31_p0, %s29_s14), 0  ;;  %p52_p5 = scmp.eq.s32.totalorder %s356_s12, 0 }
   0xb   : > { %p630_p4 = por %p46_p2, %p45_p1  ;;  %s33_s17 = ssub.s32 %s566_s10, %s782_s14 }
   0xc   : > { %p77_p6 = scmp.eq.s32.totalorder %s356_s12, 1  ;;  %p36_p7 = scmp.eq.s32.totalorder %s33_s17, 0 }
   0xd   : > { %p636_p8 = por %p52_p5, %p51_p3  ;;  %p83_p10 = scmp.eq.s32.totalorder %s357_s13, 1 }
   0xe   : > { %p640_p9 = por %p77_p6, %p45_p1  ;;  %p407_p13 = scmp.lt.s32.totalorder %s570_s11, 2 }
   0xf   : > { %s645_s20 = scalar_select %p36_p7, %s558_s8, %s38_s15  }
  0x10   : > { %p647_p11 = por %p83_p10, %p51_p3  ;;  %s103_s22 = sand.u32 1, %s558_s8  }
  0x11   : > { %s390_s23 = smul.u32 168, %s103_s22  ;;  %p657_p0 = pnand %p407_p13, %p630_p4 }
  0x12   : > { %s391_s24 = smul.u32 2688, %s566_s10  ;;  %p361_p1 = scmp.ge.s32.totalorder %s570_s11, 1 }
  0x13   : > { %s107_s29 = scalar_lea.vmem [#allocation2], %s390_s23  ;;  %s104_s2 = scalar_lea.sflag [#allocation3], %s103_s22 }
  0x14   : > { %s114_s28 = scalar_lea.hbm %s768_s0, %s391_s24  ;;  %s115_s30 = sshll.u32 %s107_s29, 4  ;;  %s116_s30 = int_to_ptr.vmem [resolvable:$true] %s115_s30 }
  0x15   : > { %p464_p2 = pneg %p657_p0  ;;  %s475_s3 = scalar_lea.vmem %s116_s30, 2688 }
  0x16   : > { %p476_p3 = scmp.ne.s32.totalorder %s116_s30, %s475_s3  ;;  %s572_s4 = smov [#allocation2]  }
  0x17   : > { %s480_s5 = sshll.u32 %s572_s4, 4  ;;  %s481_s5 = int_to_ptr.vmem [resolvable:$false] %s480_s5 }
  0x18   : > { %p478_p5 = pnand %p476_p3, %p464_p2  ;;  %s482_s12 = scalar_lea.vmem %s481_s5, 5376 }
  0x19   : > { %p483_p4 = scmp.lt.s32.totalorder %s116_s30, %s481_s5  ;;  %p484_p7 = scmp.lt.s32.totalorder %s482_s12, %s475_s3 }
  0x1a   : > { %p479_p6 = pneg %p478_p5 }
  0x1b   : > { %p485_p10 = por %p484_p7, %p483_p4 }
  0x1d   : > { %p486_p13 = pnand %p485_p10, %p479_p6 }
  0x1f   : > { %489 = shalt.err (!%p486_p13)
}
  0x20   : > { %s573_s13 = smov 128   ;;  %s574_s15 = smov 8  }
  0x21   : > { %402 = dma.hbm_to_vmem [thread:$0]  (!%p657_p0), %s114_s28, 2688, %s116_s30, %s104_s2, %s573_s13, %s573_s13, %s574_s15  }
  0x22   : > { %p123_p12 = scmp.lt.s32.totalorder %s570_s11, 3 }
  0x24   : > { %p124_p2 = pnand %p361_p1, %p123_p12 }
  0x25   : > { %s673_s16 = sand.u32 (!%p124_p2), 1, %s554_s7  }
  0x26   : > { %127 = sbr.rel (%p124_p2) target bundleno = 93 (0x5d), region = 24  ;;  %s130_s22 = scalar_lea.sflag (!%p124_p2), [#allocation3], %s673_s16 }
  0x27   : > { %s392_s17 = smul.u32 (!%p124_p2), 168, %s673_s16 }
  0x29   : > { %s677_s23 = scalar_lea.vmem (!%p124_p2), [#allocation2], %s392_s17 }
  0x2b   : > { %541 = dma.done.wait (%p636_p8), %s130_s22, 2688  }
  0x2c   : > { %543 = vsyncadd (%p636_p8), %s130_s22, 4294964608  ;;  %s393_s24 = smul.u32 48, %s673_s16  ;;  %v152_v0 = vld [vmem:[%s677_s23] sm:$0xff]  ;;  %v363_v1 = vld [vmem:[%s677_s23 + $0x10] sm:$0xff]  ;;  %v575_v15 = vmov 0.0   ;;  %s576_s2 = smov [#allocation5]  }
  0x2d   : > { %v161_v2 = vmul.f32 0.5, %v363_v1  ;;  %v362_v3 = vld [vmem:[%s677_s23 + $0x8] sm:$0xff]  ;;  %v364_v4 = vld [vmem:[%s677_s23 + $0x18] sm:$0xff]  ;;  %v370_v7 = vld [vmem:[%s677_s23 + $0x30] sm:$0xff]  ;;  %s394_s25 = smul.u32 768, %s562_s9  ;;  %s257_s9 = scalar_lea.sflag [#allocation4], %s673_s16 }
  0x2e   : > { %v369_v5 = vld [vmem:[%s677_s23 + $0x28] sm:$0xff]  ;;  %v164_v6 = vmul.f32 0.5, %v364_v4  ;;  %v371_v8 = vld [vmem:[%s677_s23 + $0x38] sm:$0xff]  ;;  %v372_v14 = vld [vmem:[%s677_s23 + $0x40] sm:$0xff]  ;;  %s692_s18 = scalar_lea.vmem [#allocation5], %s393_s24  ;;  %s494_s3 = sshll.u32 %s576_s2, 4  ;;  %s495_s3 = int_to_ptr.vmem [resolvable:$false] %s494_s3 }
  0x2f   : > { %v162_v9 = vsub.f32 %v152_v0, %v161_v2  ;;  %v168_v10 = vadd.f32 %v161_v2, %v152_v0  ;;  %vm178_vm0 = vcmp.gt.f32.partialorder %v370_v7, %v369_v5  ;;  %v373_v18 = vld [vmem:[%s677_s23 + $0x48] sm:$0xff]  ;;  %v374_v21 = vld [vmem:[%s677_s23 + $0x50] sm:$0xff]  ;;  %v375_v24 = vld [vmem:[%s677_s23 + $0x58] sm:$0xff]  ;;  %s271_s26 = sshll.u32 %s692_s18, 4  ;;  %s719_s29 = scalar_lea.hbm %s769_s1, %s394_s25  ;;  %s713_s26 = int_to_ptr.vmem [resolvable:$true] %s271_s26 }
  0x30   : > { %v165_v11 = vsub.f32 %v362_v3, %v164_v6  ;;  %v171_v12 = vadd.f32 %v362_v3, %v164_v6  ;;  %v179_v13 = vsel %vm178_vm0, %v370_v7, %v369_v5  ;;  %v180_v16 = vsel %vm178_vm0, 1.0, %v575_v15  ;;  %v376_v27 = vld [vmem:[%s677_s23 + $0x60] sm:$0xff]  ;;  %v377_v30 = vld [vmem:[%s677_s23 + $0x68] sm:$0xff]  ;;  %v378_v33 = vld [vmem:[%s677_s23 + $0x70] sm:$0xff]  ;;  %s490_s30 = scalar_lea.vmem %s713_s26, 768  ;;  %s496_s4 = scalar_lea.vmem %s495_s3, 1536 }
  0x31   : > { %163 = vst [vmem:[%s692_s18] sm:$0xff] %v162_v9  ;;  %367 = vst [vmem:[%s692_s18 + $0x10] sm:$0xff] %v168_v10  ;;  %vm183_vm1 = vcmp.gt.f32.partialorder %v371_v8, %v179_v13  ;;  %v379_v36 = vld [vmem:[%s677_s23 + $0x78] sm:$0xff]  ;;  %v380_v39 = vld [vmem:[%s677_s23 + $0x80] sm:$0xff]  ;;  %p491_p8 = scmp.ne.s32.totalorder %s713_s26, %s490_s30  ;;  %p497_p1 = scmp.lt.s32.totalorder %s713_s26, %s495_s3 }
  0x32   : > { %366 = vst [vmem:[%s692_s18 + $0x8] sm:$0xff] %v165_v11  ;;  %368 = vst [vmem:[%s692_s18 + $0x18] sm:$0xff] %v171_v12  ;;  %v184_v17 = vsel %vm183_vm1, %v371_v8, %v179_v13  ;;  %v185_v19 = vsel %vm183_vm1, 2.0, %v180_v16  ;;  %v381_v42 = vld [vmem:[%s677_s23 + $0x88] sm:$0xff]  ;;  %v382_v45 = vld [vmem:[%s677_s23 + $0x90] sm:$0xff]  ;;  %p498_p3 = scmp.lt.s32.totalorder %s496_s4, %s490_s30 }
  0x33   : > { %vm188_vm2 = vcmp.gt.f32.partialorder %v372_v14, %v184_v17  ;;  %v383_v48 = vld [vmem:[%s677_s23 + $0x98] sm:$0xff]  ;;  %v384_v51 = vld [vmem:[%s677_s23 + $0xa0] sm:$0xff]  ;;  %p492_p12 = pnand %p491_p8, %p640_p9 }
  0x34   : > { %v189_v20 = vsel %vm188_vm2, %v372_v14, %v184_v17  ;;  %v190_v22 = vsel %vm188_vm2, 3.0, %v185_v19  ;;  %v365_v53 = vld [vmem:[%s677_s23 + $0x20] sm:$0xff]  ;;  %p499_p5 = por %p498_p3, %p497_p1 }
  0x35   : > { %vm193_vm3 = vcmp.gt.f32.partialorder %v373_v18, %v189_v20  ;;  %p493_p0 = pneg %p492_p12 }
  0x36   : > { %v194_v23 = vsel %vm193_vm3, %v373_v18, %v189_v20  ;;  %v195_v25 = vsel %vm193_vm3, 4.0, %v190_v22 }
  0x37   : > { %vm198_vm4 = vcmp.gt.f32.partialorder %v374_v21, %v194_v23  ;;  %p500_p6 = pnand %p499_p5, %p493_p0 }
  0x38   : > { %v199_v26 = vsel %vm198_vm4, %v374_v21, %v194_v23  ;;  %v200_v28 = vsel %vm198_vm4, 5.0, %v195_v25 }
  0x39   : > { %vm203_vm5 = vcmp.gt.f32.partialorder %v375_v24, %v199_v26 }
  0x3a   : > { %v204_v29 = vsel %vm203_vm5, %v375_v24, %v199_v26  ;;  %v205_v31 = vsel %vm203_vm5, 6.0, %v200_v28 }
  0x3b   : > { %vm208_vm6 = vcmp.gt.f32.partialorder %v376_v27, %v204_v29 }
  0x3c   : > { %v209_v32 = vsel %vm208_vm6, %v376_v27, %v204_v29  ;;  %v210_v34 = vsel %vm208_vm6, 7.0, %v205_v31 }
  0x3d   : > { %vm213_vm7 = vcmp.gt.f32.partialorder %v377_v30, %v209_v32 }
  0x3e   : > { %v214_v35 = vsel %vm213_vm7, %v377_v30, %v209_v32  ;;  %v215_v37 = vsel %vm213_vm7, 8.0, %v210_v34 }
  0x3f   : > { %vm218_vm8 = vcmp.gt.f32.partialorder %v378_v33, %v214_v35 }
  0x40   : > { %v219_v38 = vsel %vm218_vm8, %v378_v33, %v214_v35  ;;  %v220_v40 = vsel %vm218_vm8, 9.0, %v215_v37 }
  0x41   : > { %vm223_vm9 = vcmp.gt.f32.partialorder %v379_v36, %v219_v38 }
  0x42   : > { %v224_v41 = vsel %vm223_vm9, %v379_v36, %v219_v38  ;;  %v225_v43 = vsel %vm223_vm9, 10.0, %v220_v40 }
  0x43   : > { %vm228_vm10 = vcmp.gt.f32.partialorder %v380_v39, %v224_v41 }
  0x44   : > { %v229_v44 = vsel %vm228_vm10, %v380_v39, %v224_v41  ;;  %v230_v46 = vsel %vm228_vm10, 11.0, %v225_v43 }
  0x45   : > { %vm233_vm11 = vcmp.gt.f32.partialorder %v381_v42, %v229_v44 }
  0x46   : > { %v234_v47 = vsel %vm233_vm11, %v381_v42, %v229_v44  ;;  %v235_v49 = vsel %vm233_vm11, 12.0, %v230_v46 }
  0x47   : > { %vm238_vm12 = vcmp.gt.f32.partialorder %v382_v45, %v234_v47 }
  0x48   : > { %v239_v50 = vsel %vm238_vm12, %v382_v45, %v234_v47  ;;  %v240_v52 = vsel %vm238_vm12, 13.0, %v235_v49 }
  0x49   : > { %vm243_vm13 = vcmp.gt.f32.partialorder %v383_v48, %v239_v50 }
  0x4a   : > { %v244_v54 = vsel %vm243_vm13, %v383_v48, %v239_v50  ;;  %v245_v55 = vsel %vm243_vm13, 14.0, %v240_v52 }
  0x4b   : > { %vm248_vm14 = vcmp.gt.f32.partialorder %v384_v51, %v244_v54 }
  0x4c   : > { %v249_v56 = vsel %vm248_vm14, %v384_v51, %v244_v54  ;;  %v250_v57 = vsel %vm248_vm14, 15.0, %v245_v55 }
  0x4d   : > { %v251_v58 = vmul.f32 %v365_v53, %v249_v56  ;;  %386 = vst [vmem:[%s692_s18 + $0x28] sm:$0xff] %v250_v57 }
  0x4f   : > { %385 = vst [vmem:[%s692_s18 + $0x20] sm:$0xff] %v251_v58 }
  0x50   : > { %503 = shalt.err (!%p500_p6)
}
  0x51   : > { %s504_s5 = scalar_lea.hbm %s719_s29, 768  ;;  %s508_s15 = scalar_lea.hbm %s769_s1, 1536 }
  0x52   : > { %p505_p4 = scmp.ne.s32.totalorder %s719_s29, %s504_s5  ;;  %p509_p13 = scmp.lt.s32.totalorder %s719_s29, %s769_s1 }
  0x53   : > { %p510_p2 = scmp.lt.s32.totalorder %s508_s15, %s504_s5 }
  0x54   : > { %p506_p7 = pnand %p505_p4, %p640_p9 }
  0x55   : > { %p511_p8 = por %p510_p2, %p509_p13 }
  0x56   : > { %p507_p10 = pneg %p506_p7 }
  0x58   : > { %p512_p12 = pnand %p511_p8, %p507_p10 }
  0x5a   : > { %515 = shalt.err (!%p512_p12)
}
  0x5b   : > { %s577_s23 = smov 128   ;;  %s578_s24 = smov 8  }
  0x5c   : > { %397 = dma.vmem_to_hbm [thread:$0]  (%p640_p9), %s713_s26, 768, %s719_s29, %s257_s9, %s577_s23, %s577_s23, %s578_s24  }
  0x5d PF: > { %s286_s18 = sand.u32 1, %s550_s6   ;;  %p775_p0 = scmp.ge.s32.totalorder %s570_s11, 2 }
  0x5e   : > { %s287_s25 = scalar_lea.sflag [#allocation4], %s286_s18 }
  0x5f   : > { %p404_p1 = pnand %p775_p0, %p647_p11 }
  0x61   : > { %p405_p3 = pneg %p404_p1 }
  0x63   : > { %545 = dma.done.wait (%p405_p3), %s287_s25, 768  }
  0x64   : > { %547 = vsyncadd (%p405_p3), %s287_s25, 4294966528  ;;  %s17_s11 = sadd.s32 1, %s570_s11   ;;  %s776_s6 = smov %s554_s7 }
  0x65   : > { %p14_p5 = scmp.ge.s32.totalorder %s17_s11, 4   ;;  %s777_s7 = smov %s558_s8 }
  0x66   : > { %s778_s8 = smov %s645_s20  ;;  %s779_s9 = smov %s566_s10 }
  0x67   : > { %s780_s10 = smov %s782_s14  ;;  %16 = sbr.rel (!%p14_p5) target bundleno = 6 (0x6), region = 94 }
  0x6c   :  { %292 = vsyncpa [#allocation3], 1 }
  0x6d   :  { %294 = vsyncpa [#allocation3 + $0x1], 1 }
  0x6e   :  { %295 = vsyncpa [#allocation4], 1 }
  0x6f   :  { %297 = vsyncpa [#allocation4 + $0x1], 1 }

</bundles_post_ra>
